<compile_context>
chip_gen: v6e
topology: v6e:2x2x1
jax: 0.10.0
libtpu: 0.0.40
codegen_flags: <defaults>
</compile_context>

<pallas_src>
import functools

import jax
import jax.numpy as jnp
from jax.experimental import pallas as pl
from jax.experimental.pallas import tpu as pltpu


def _choose_gg_tile(GG, max_tile=2048):
    """Largest multiple-of-128 divisor of GG that is <= max_tile, else GG."""
    if GG <= max_tile or GG % 128 != 0:
        return GG
    t = (max_tile // 128) * 128
    while t >= 128:
        if GG % t == 0:
            return t
        t -= 128
    return GG


def _vfsn_kernel(stride, anchor_w, anchor_h, pred_ref, grid_ref, out_ref):
    """Decode one (batch, anchor, GG-tile) block.

    pred_ref : VMEM (C5, TG)  raw network outputs (native dtype)
    grid_ref : VMEM (2, TG)   row 0 = grid_x, row 1 = grid_y (f32)
    out_ref  : VMEM (C5, TG)  decoded output, channel-major (lane-dense)

    anchor_w / anchor_h are Python tuples of compile-time floats holding
    (anchor / stride) * stride per anchor; stride is a compile-time float.
    """
    a = pl.program_id(1)                                    # anchor index

    p = pred_ref[...].astype(jnp.float32)                   # (C5, TG)
    sig = jax.nn.sigmoid(p)

    # Full lane-dense slab store (conf + classes); rows 0:4 overwritten below.
    out_ref[...] = sig.astype(out_ref.dtype)

    # Rows 0:2 -> (sigmoid(xy) + grid_offset) * stride.
    xy = (sig[0:2, :] + grid_ref[...]) * stride
    out_ref[0:2, :] = xy.astype(out_ref.dtype)

    # Rows 2:4 -> exp(wh) * anchor (anchor already includes the stride factor).
    aw = jnp.float32(anchor_w[0])
    ah = jnp.float32(anchor_h[0])
    for i in range(1, len(anchor_w)):                        # A is 2-3: unrolled
        aw = jnp.where(a == i, jnp.float32(anchor_w[i]), aw)
        ah = jnp.where(a == i, jnp.float32(anchor_h[i]), ah)
    row = jax.lax.broadcasted_iota(jnp.int32, (2, 1), 0)
    anchor_wh = jnp.where(row == 0, aw, ah)                  # (2, 1)
    wh = jnp.exp(p[2:4, :]) * anchor_wh                      # single fused EUP pass
    out_ref[2:4, :] = wh.astype(out_ref.dtype)


def vfsn_forward(x, anchors, anchor_idx, num_classes, img_dim=224,
                 out_dtype=None, max_gg_tile=2048):
    """JAX/Pallas equivalent of VFSNLayer.forward(x, targets=None)."""
    B = x.shape[0]
    G = x.shape[2]
    A = len(anchor_idx)
    C5 = num_classes + 5
    GG = G * G
    stride = float(img_dim) / float(G)
    if out_dtype is None:
        out_dtype = x.dtype

    # Effective per-anchor scale = (anchor / stride) * stride, baked at trace
    # time as Python constants (no scalar-prefetch / SMEM table).
    anchor_w = tuple((float(anchors[2 * i]) / stride) * stride for i in anchor_idx)
    anchor_h = tuple((float(anchors[2 * i + 1]) / stride) * stride for i in anchor_idx)

    TG = _choose_gg_tile(GG, max_gg_tile)
    NG = GG // TG

    # Contiguous (metadata-only) reshape; keep native dtype (kernel upcasts in
    # vregs, so bf16 checkpoints pay half the input HBM traffic).
    pred = x.reshape(B, A, C5, GG)

    # Fused grid-offset constant: row 0 = grid_x (col idx), row 1 = grid_y.
    gx = jnp.tile(jnp.arange(G, dtype=jnp.float32), (G,))    # (GG,)
    gy = jnp.repeat(jnp.arange(G, dtype=jnp.float32), G)     # (GG,)
    grid2 = jnp.stack([gx, gy], axis=0)                      # (2, GG)

    kernel = functools.partial(_vfsn_kernel, stride, anchor_w, anchor_h)

    out = pl.pallas_call(
        kernel,
        out_shape=jax.ShapeDtypeStruct((B, A, C5, GG), out_dtype),
        grid=(B, A, NG),
        in_specs=[
            pl.BlockSpec((None, None, C5, TG), lambda b, a, g: (b, a, 0, g)),
            pl.BlockSpec((2, TG), lambda b, a, g: (0, g)),
        ],
        out_specs=pl.BlockSpec((None, None, C5, TG), lambda b, a, g: (b, a, 0, g)),
        compiler_params=pltpu.CompilerParams(
            dimension_semantics=("parallel", "parallel", "parallel"),
        ),
    )(pred, grid2)

    # Permute the channel-major, lane-dense kernel output to the torch.cat
    # layout; this fuses into downstream XLA consumers.
    output = out.transpose(0, 1, 3, 2).reshape(B, A * GG, C5)
    return output, 0


def _reference(x, anchors, anchor_idx, num_classes, img_dim):
    """Pure-JAX replica of the PyTorch forward (targets=None path)."""
    B, _, G, _ = x.shape
    A = len(anchor_idx)
    C5 = num_classes + 5
    stride = float(img_dim) / float(G)

    pred = x.reshape(B, A, C5, G, G).transpose(0, 1, 3, 4, 2)  # (B,A,G,G,C5)
    sx = jax.nn.sigmoid(pred[..., 0])
    sy = jax.nn.sigmoid(pred[..., 1])
    w = pred[..., 2]
    h = pred[..., 3]
    conf = jax.nn.sigmoid(pred[..., 4])
    cls = jax.nn.sigmoid(pred[..., 5:])

    grid_x = jnp.arange(G, dtype=jnp.float32).reshape(1, 1, 1, G)
    grid_y = jnp.arange(G, dtype=jnp.float32).reshape(1, 1, G, 1)
    pairs = [(anchors[2 * i], anchors[2 * i + 1]) for i in anchor_idx]
    aw = jnp.array([p[0] / stride for p in pairs], jnp.float32).reshape(1, A, 1, 1)
    ah = jnp.array([p[1] / stride for p in pairs], jnp.float32).reshape(1, A, 1, 1)

    boxes = jnp.stack(
        [sx + grid_x, sy + grid_y, jnp.exp(w) * aw, jnp.exp(h) * ah], axis=-1
    )
    return jnp.concatenate(
        [
            boxes.reshape(B, -1, 4) * stride,
            conf.reshape(B, -1, 1),
            cls.reshape(B, -1, num_classes),
        ],
        axis=-1,
    )


if __name__ == "__main__":
    # Small, deterministic config: 2 anchors, 3 classes, 16x16 grid.
    B, G, num_classes, img_dim = 2, 16, 3, 224
    anchor_idx = [0, 1]
    anchors = [10, 13, 16, 30, 33, 23]
    A = len(anchor_idx)
    C5 = num_classes + 5

    key = jax.random.PRNGKey(0)
    x = jax.random.normal(key, (B, A * C5, G, G), dtype=jnp.float32)

    out, _ = vfsn_forward(x, anchors, anchor_idx, num_classes, img_dim)
    out = jax.block_until_ready(out)

    ref = _reference(x, anchors, anchor_idx, num_classes, img_dim)
    assert out.shape == (B, A * G * G, C5), out.shape
    assert jnp.allclose(out, ref, rtol=1e-5, atol=1e-5), "mismatch vs reference"
    print("KERNEL_OK")
</pallas_src>

<mosaic_0001>
module attributes {stable_mosaic.version = 11 : i64} {
  func.func @_vfsn_kernel(%arg0: i32, %arg1: i32, %arg2: i32, %arg3: memref<1x1x8x256xf32, #tpu.memory_space<vmem>>, %arg4: memref<2x256xf32, #tpu.memory_space<vmem>>, %arg5: memref<1x1x8x256xf32, #tpu.memory_space<vmem>>) attributes {dimension_semantics = [#tpu.dimension_semantics<parallel>, #tpu.dimension_semantics<parallel>, #tpu.dimension_semantics<parallel>], iteration_bounds = array<i64: 2, 2, 1>, scalar_prefetch = 0 : i64, scratch_operands = 0 : i64, tpu.core_type = #tpu.core_type<tc>, window_params = [{transform_indices = @transform_0, window_bounds = array<i64: 1, 1, 8, 256>}, {transform_indices = @transform_1, window_bounds = array<i64: 2, 256>}, {transform_indices = @transform_2, window_bounds = array<i64: 1, 1, 8, 256>}]} {
    %c0 = arith.constant 0 : index
    %c0_0 = arith.constant 0 : index
    %c0_1 = arith.constant 0 : index
    %c0_2 = arith.constant 0 : index
    %0 = vector.load %arg3[%c0, %c0_0, %c0_1, %c0_2] : memref<1x1x8x256xf32, #tpu.memory_space<vmem>>, vector<1x1x8x256xf32>
    %1 = vector.shape_cast %0 : vector<1x1x8x256xf32> to vector<8x256xf32>
    %2 = arith.negf %1 : vector<8x256xf32>
    %3 = math.exp %2 : vector<8x256xf32>
    %cst = arith.constant 1.000000e+00 : f32
    %4 = vector.broadcast %cst : f32 to vector<8x256xf32>
    %5 = arith.addf %4, %3 : vector<8x256xf32>
    %6 = arith.divf %4, %5 : vector<8x256xf32>
    %c0_3 = arith.constant 0 : index
    %c0_4 = arith.constant 0 : index
    %c0_5 = arith.constant 0 : index
    %c0_6 = arith.constant 0 : index
    %7 = vector.load %arg5[%c0_3, %c0_4, %c0_5, %c0_6] : memref<1x1x8x256xf32, #tpu.memory_space<vmem>>, vector<1x1x8x256xf32>
    %8 = vector.shape_cast %7 : vector<1x1x8x256xf32> to vector<8x256xf32>
    %9 = vector.shape_cast %6 : vector<8x256xf32> to vector<1x1x8x256xf32>
    tpu.vector_store %arg5[%c0_3, %c0_4, %c0_5, %c0_6], %9 {strides = array<i32>} : memref<1x1x8x256xf32, #tpu.memory_space<vmem>>, vector<1x1x8x256xf32>,
    %10 = vector.extract_strided_slice %6 {offsets = [0, 0], sizes = [2, 256], strides = [1, 1]} : vector<8x256xf32> to vector<2x256xf32>
    %c0_7 = arith.constant 0 : index
    %c0_8 = arith.constant 0 : index
    %11 = vector.load %arg4[%c0_7, %c0_8] : memref<2x256xf32, #tpu.memory_space<vmem>>, vector<2x256xf32>
    %12 = arith.addf %10, %11 : vector<2x256xf32>
    %cst_9 = arith.constant 1.400000e+01 : f32
    %13 = vector.broadcast %cst_9 : f32 to vector<2x256xf32>
    %14 = arith.mulf %12, %13 : vector<2x256xf32>
    %c0_10 = arith.constant 0 : index
    %c0_11 = arith.constant 0 : index
    %c0_12 = arith.constant 0 : index
    %c0_13 = arith.constant 0 : index
    %15 = vector.load %arg5[%c0_10, %c0_11, %c0_12, %c0_13] : memref<1x1x8x256xf32, #tpu.memory_space<vmem>>, vector<1x1x2x256xf32>
    %16 = vector.shape_cast %15 : vector<1x1x2x256xf32> to vector<2x256xf32>
    %17 = vector.shape_cast %14 : vector<2x256xf32> to vector<1x1x2x256xf32>
    tpu.vector_store %arg5[%c0_10, %c0_11, %c0_12, %c0_13], %17 {strides = array<i32>} : memref<1x1x8x256xf32, #tpu.memory_space<vmem>>, vector<1x1x2x256xf32>,
    %c1_i32 = arith.constant 1 : i32
    %18 = arith.cmpi eq, %arg1, %c1_i32 : i32
    %cst_14 = arith.constant 1.600000e+01 : f32
    %cst_15 = arith.constant 1.000000e+01 : f32
    %19 = arith.select %18, %cst_14, %cst_15 : f32
    %c1_i32_16 = arith.constant 1 : i32
    %20 = arith.cmpi eq, %arg1, %c1_i32_16 : i32
    %cst_17 = arith.constant 3.000000e+01 : f32
    %cst_18 = arith.constant 1.300000e+01 : f32
    %21 = arith.select %20, %cst_17, %cst_18 : f32
    %22 = tpu.iota {dimensions = array<i32: 0>} : vector<2x1xi32>
    %c0_i32 = arith.constant 0 : i32
    %23 = vector.broadcast %c0_i32 : i32 to vector<2x1xi32>
    %24 = arith.cmpi eq, %22, %23 : vector<2x1xi32>
    %25 = vector.broadcast %19 : f32 to vector<2x1xf32>
    %26 = vector.broadcast %21 : f32 to vector<2x1xf32>
    %27 = arith.select %24, %25, %26 : vector<2x1xi1>, vector<2x1xf32>
    %28 = vector.extract_strided_slice %1 {offsets = [2, 0], sizes = [2, 256], strides = [1, 1]} : vector<8x256xf32> to vector<2x256xf32>
    %29 = math.exp %28 : vector<2x256xf32>
    %30 = vector.broadcast %27 : vector<2x1xf32> to vector<2x256xf32>
    %31 = arith.mulf %29, %30 : vector<2x256xf32>
    %c0_19 = arith.constant 0 : index
    %c0_20 = arith.constant 0 : index
    %c2 = arith.constant 2 : index
    %c0_21 = arith.constant 0 : index
    %32 = vector.load %arg5[%c0_19, %c0_20, %c2, %c0_21] : memref<1x1x8x256xf32, #tpu.memory_space<vmem>>, vector<1x1x2x256xf32>
    %33 = vector.shape_cast %32 : vector<1x1x2x256xf32> to vector<2x256xf32>
    %34 = vector.shape_cast %31 : vector<2x256xf32> to vector<1x1x2x256xf32>
    tpu.vector_store %arg5[%c0_19, %c0_20, %c2, %c0_21], %34 {strides = array<i32>} : memref<1x1x8x256xf32, #tpu.memory_space<vmem>>, vector<1x1x2x256xf32>,
    return
  }
  func.func @transform_0(%arg0: i32, %arg1: i32, %arg2: i32) -> (i32, i32, i32, i32) {
    %c0_i32 = arith.constant 0 : i32
    %c0_i32_0 = arith.constant 0 : i32
    return %arg0, %arg1, %c0_i32, %arg2 : i32, i32, i32, i32
  }
  func.func @transform_1(%arg0: i32, %arg1: i32, %arg2: i32) -> (i32, i32) {
    %c0_i32 = arith.constant 0 : i32
    %c0_i32_0 = arith.constant 0 : i32
    return %c0_i32, %arg2 : i32, i32
  }
  func.func @transform_2(%arg0: i32, %arg1: i32, %arg2: i32) -> (i32, i32, i32, i32) {
    %c0_i32 = arith.constant 0 : i32
    %c0_i32_0 = arith.constant 0 : i32
    return %arg0, %arg1, %c0_i32, %arg2 : i32, i32, i32, i32
  }
}

</mosaic_0001>

<bundles_post_ra>
// kernel: tpu_custom_call.1
= control target key start
LH: loop header
LB: loop body
LE: loop exit
PB: predicated region body
PF: predicated region fallthrough
CT: control target
= control target key end

     0   :  { %s885_s0 = inlined_call_operand.hbm [shape: f32[2,2,8,256], index: 0, kind: input, shape index: {}]   ;;  %s886_s1 = inlined_call_operand.hbm [shape: f32[2,256], index: 1, kind: input, shape index: {}]   ;;  %s887_s2 = inlined_call_operand.hbm [shape: f32[2,2,8,256], index: 2, kind: output, shape index: {}]  }
   0x1   :  { %891 = sst [smem:[#allocation14_spill]] %s886_s1 }
   0x2   :  { %7 = vsyncpa [#allocation3], 0 }
   0x3   :  { %9 = vsyncpa [#allocation3 + $0x1], 0 }
   0x4   :  { %10 = vsyncpa [#allocation6], 0 }
   0x5   :  { %11 = vsyncpa [#allocation4], 0 }
   0x6   :  { %13 = vsyncpa [#allocation4 + $0x1], 0  ;;  %s691_s9 = smov 0   ;;  %s693_s10 = smov 0  }
   0x7   :  { %s695_s11 = smov 0   ;;  %s697_s12 = smov 0  }
   0x8   :  { %s699_s13 = smov 0   ;;  %s701_s14 = smov 0  }
   0x9   :  { %s703_s15 = smov 0   ;;  %s705_s16 = smov 0  }
   0xa LB: > { %892 = sst [smem:[#allocation11_spill]] %s663_s14  ;;  %s394_s17 = sadd.s32 4294967295, %s671_s16   ;;  %s671_s16 = sphi %s705_s16, %s19_s16   ;;  %s667_s15 = sphi %s703_s15, %s912_s15   ;;  %s663_s14 = sphi %s701_s14, %s907_s14   ;;  %s659_s13 = sphi %s699_s13, %s911_s13   ;;  %s655_s12 = sphi %s697_s12, %s906_s12   ;;  %s651_s11 = sphi %s695_s11, %s910_s11   ;;  %s647_s10 = sphi %s693_s10, %s909_s10   ;;  %s643_s9 = sphi %s691_s9, %s908_s9  }
   0xb   : > { %s395_s18 = sadd.s32 4294967294, %s671_s16   ;;  %p62_p0 = scmp.ne.s32.totalorder %s647_s10, %s643_s9 }
   0xc   : > { %p735_p1 = scmp.eq.s32.totalorder %s394_s17, 0  ;;  %p739_p2 = scmp.eq.s32.totalorder %s394_s17, 3 }
   0xd   : > { %p122_p3 = scmp.eq.s32.totalorder %s395_s18, 3  ;;  %p396_p5 = scmp.ge.s32.totalorder %s671_s16, 1 }
   0xe   : > { %p745_p4 = por %p735_p1, %p62_p0  ;;  %p129_p7 = scmp.lt.s32.totalorder %s671_s16, 5 }
   0xf   : > { %p750_p6 = por %p122_p3, %p62_p0  ;;  %s673_s24 = smov [#allocation5]  }
  0x10   : > { %p755_p8 = pnand %p396_p5, %p129_p7  ;;  %s145_s25 = sshll.u32 %s673_s24, 4  ;;  %s146_s25 = int_to_ptr.vmem [resolvable:$true] %s145_s25 }
  0x11   : > { %s896_s22 = scalar_select %p750_p6, 1, 0 }
  0x12   : > { %p424_p9 = pneg %p755_p8  ;;  %s34_s26 = sadd.s32 1, %s663_s14 }
  0x13   : > { %897 = sst [smem:[#allocation12_spill]] %s896_s22  ;;  %s528_s27 = scalar_lea.vmem %s146_s25, 64 }
  0x14   : > { %p425_p10 = pnand %p424_p9, %p735_p1  ;;  %p529_p12 = scmp.ne.s32.totalorder %s146_s25, %s528_s27 }
  0x15   : > { %p536_p3 = scmp.lt.s32.totalorder %s146_s25, %s146_s25  ;;  %p537_p6 = scmp.lt.s32.totalorder %s528_s27, %s528_s27 }
  0x16   : > { %p519_p11 = pneg %p425_p10 }
  0x17   : > { %p538_p5 = por %p537_p6, %p536_p3 }
  0x18   : > { %p531_p13 = pnand %p529_p12, %p519_p11 }
  0x1a   : > { %p532_p0 = pneg %p531_p13 }
  0x1c   : > { %p539_p7 = pnand %p538_p5, %p532_p0 }
  0x1e   : > { %542 = shalt.err (!%p539_p7)
}
  0x1f   : > { %s899_s1 = sld [smem:[#allocation14_spill]]  ;;  %p36_p9 = scmp.ge.s32.totalorder %s34_s26, 2 }
  0x20   : > { %s38_s30 = sadd.s32 1, %s667_s15  ;;  %s49_s3 = sadd.s32 1, %s651_s11 }
  0x21   : > { %p56_p6 = scmp.ne.s32.totalorder %s651_s11, %s647_s10  ;;  %s914_s26 = smov (%p36_p9, %s34_s26), 0 }
  0x22   : > { %900 = sst [smem:[#allocation13_spill]] %s914_s26  ;;  %s916_s30 = smov (!%p36_p9, %s38_s30), %s667_s15 }
  0x23   : > { %s43_s4 = ssub.s32 %s663_s14, %s914_s26  ;;  %p57_p11 = scmp.eq.s32.totalorder %s671_s16, 0 }
  0x24   : > { %p40_p12 = scmp.ge.s32.totalorder %s916_s30, 2  ;;  %p779_p13 = por %p739_p2, %p56_p6 }
  0x25   : > { %427 = dma.hbm_to_vmem [thread:$0]  (!%p425_p10), %s899_s1, 64, %s146_s25, [#allocation6]  }
  0x26   : > { %p783_p10 = por %p57_p11, %p56_p6  ;;  %p437_p0 = scmp.lt.s32.totalorder %s671_s16, 4 }
  0x27   : > { %s918_s30 = smov (%p40_p12, %s916_s30), 0  ;;  %s156_s7 = sand.u32 1, %s651_s11  }
  0x28   : > { %s400_s8 = sshll.u32 %s663_s14, 1  ;;  %s42_s17 = ssub.s32 %s667_s15, %s918_s30 }
  0x29   : > { %s44_s18 = sor.u32 %s43_s4, %s42_s17  ;;  %s399_s24 = sshll.u32 %s156_s7, 4 }
  0x2a   : > { %p47_p3 = scmp.eq.s32.totalorder %s44_s18, 0  ;;  %s401_s20 = sshll.u32 %s667_s15, 2 }
  0x2b   : > { %s160_s25 = scalar_lea.vmem [#allocation2], %s399_s24  ;;  %s168_s29 = sadd.s32 %s401_s20, %s400_s8 }
  0x2c   : > { %s172_s27 = sshll.u32 %s160_s25, 4  ;;  %s402_s1 = sshll.u32 %s168_s29, 7  ;;  %s173_s27 = int_to_ptr.vmem [resolvable:$true] %s172_s27 }
  0x2d   : > { %s796_s28 = scalar_select %p47_p3, %s651_s11, %s49_s3  }
  0x2e   : > { %p802_p2 = pnand %p437_p0, %p783_p10  ;;  %s170_s4 = scalar_lea.hbm %s885_s0, %s402_s1 }
  0x2f   : > { %s157_s17 = scalar_lea.sflag [#allocation3], %s156_s7  ;;  %s556_s18 = scalar_lea.vmem %s173_s27, 256 }
  0x30   : > { %p545_p5 = pneg %p802_p2  ;;  %p557_p7 = scmp.ne.s32.totalorder %s173_s27, %s556_s18 }
  0x31   : > { %s674_s3 = smov [#allocation2]  }
  0x32   : > { %p559_p9 = pnand %p557_p7, %p545_p5  ;;  %s561_s8 = sshll.u32 %s674_s3, 4  ;;  %s562_s8 = int_to_ptr.vmem [resolvable:$false] %s561_s8 }
  0x33   : > { %s563_s6 = scalar_lea.vmem %s562_s8, 512  ;;  %p564_p11 = scmp.lt.s32.totalorder %s173_s27, %s562_s8 }
  0x34   : > { %p560_p6 = pneg %p559_p9  ;;  %p565_p12 = scmp.lt.s32.totalorder %s563_s6, %s556_s18 }
  0x36   : > { %p566_p10 = por %p565_p12, %p564_p11 }
  0x38   : > { %p567_p0 = pnand %p566_p10, %p560_p6 }
  0x3a   : > { %570 = shalt.err (!%p567_p0)
}
  0x3b   : > { %431 = dma.hbm_to_vmem [thread:$0]  (!%p802_p2), %s170_s4, 256, %s173_s27, %s157_s17  }
  0x3c   : > { %181 = sbr.rel (%p755_p8) target bundleno = 119 (0x77), region = 28  ;;  %s816_s1 = sand.u32 (!%p755_p8), 1, %s647_s10  }
  0x3d   : > { %s404_s14 = sshll.u32 (!%p755_p8), %s816_s1, 4  ;;  %s184_s22 = scalar_lea.sflag (!%p755_p8), [#allocation3], %s816_s1 }
  0x3e   : > { %s187_s7 = scalar_lea.vmem (!%p755_p8), [#allocation2], %s404_s14 }
  0x41   : > { %630 = dma.done.wait (%p745_p4), %s184_s22, 256  }
  0x42   : > { %632 = vsyncadd (%p745_p4), %s184_s22, 4294967040 }
  0x43   : > { %634 = dma.done.wait (%p735_p1), [#allocation6], 64  }
  0x44   : > { %636 = vsyncadd (%p735_p1), [#allocation6], 4294967232  ;;  %v215_v0 = vld [vmem:[%s187_s7] sm:$0xff]  ;;  %v216_v1 = vld [vmem:[%s187_s7 + $0x8] sm:$0xff]  ;;  %p249_p8 = scmp.eq.s32.totalorder %s655_s12, 1  ;;  %v252_v6 = vlaneseq  ;;  %s411_s19 = sshll.u32 %s655_s12, 1 }
  0x45   : > { %v407_v2 = vmul.f32 -1.442695, %v215_v0  ;;  %v408_v3 = vmul.f32 -1.442695, %v216_v1  ;;  %v258_v4 = vmul.f32 1.442695, %v215_v0 }
  0x46   : > { %v260_v5 = vmul.f32 1.442695, %v216_v1  ;;  %s250_s21 = scalar_select %p249_p8, 16.0, 10.0  ;;  %v253_v8 = vshrl.u32 %v252_v6, 7 }
  0x47   : > { %505 = vpow2.f32 %v407_v2  ;;  %s251_s23 = scalar_select %p249_p8, 30.0, 13.0  ;;  %v409_v17 = vld.sshfl [vmem:[#allocation5] sm:$0x33 pattern:$0x76325410] }
  0x48   : > { %507 = vpow2.f32 %v408_v3  ;;  %vm254_vm0 = vcmp.eq.s32.totalorder %v253_v8, 0  ;;  %v255_v12 = vstv %s250_s21  ;;  %s412_s26 = sshll.u32 %s659_s13, 2  ;;  %v240_v19 = vcombine.high %v409_v17, %v409_v17  ;;  %s211_s20 = scalar_lea.vmem [#allocation7], %s404_s14 }
  0x49   : > { %509 = vpow2.f32 %v258_v4  ;;  %v256_v13 = vstv %s251_s23  ;;  %s284_s24 = sadd.s32 %s412_s26, %s411_s19  ;;  %s288_s25 = sshll.u32 %s211_s20, 4  ;;  %s835_s25 = int_to_ptr.vmem [resolvable:$true] %s288_s25 }
  0x4a   : > { %511 = vpow2.f32 %v260_v5  ;;  %v257_v14 = vsel %vm254_vm0, %v255_v12, %v256_v13  ;;  %s413_s27 = sshll.u32 %s284_s24, 7  ;;  %s270_s4 = scalar_lea.sflag [#allocation4], %s816_s1 }
  0x4b   : > { %v263_v15 = vrot.slane %v257_v14, 6  ;;  %s286_s29 = scalar_lea.hbm %s887_s2, %s413_s27  ;;  %s571_s17 = scalar_lea.vmem %s835_s25, 256 }
  0x4c   : > { %p572_p1 = scmp.ne.s32.totalorder %s835_s25, %s571_s17  ;;  %s675_s18 = smov [#allocation7]  }
  0x4d   : > { %s575_s3 = sshll.u32 %s675_s18, 4  ;;  %s576_s3 = int_to_ptr.vmem [resolvable:$false] %s575_s3 }
  0x4e   : > { %p573_p4 = pnand %p572_p1, %p779_p13  ;;  %s577_s8 = scalar_lea.vmem %s576_s3, 512 }
  0x4f   : > { %p578_p2 = scmp.lt.s32.totalorder %s835_s25, %s576_s3  ;;  %p579_p5 = scmp.lt.s32.totalorder %s577_s8, %s571_s17 }
  0x50   : > { %p574_p3 = pneg %p573_p4 }
  0x51   : > { %p580_p7 = por %p579_p5, %p578_p2 }
  0x53   : > { %p581_p9 = pnand %p580_p7, %p574_p3 }
  0x54   : > { %v506_v7 = vpop.eup %505 }
  0x55   : > { %v508_v9 = vpop.eup %507  ;;  %v223_v10 = vadd.f32 1.0, %v506_v7 }
  0x56   : > { %v224_v11 = vadd.f32 1.0, %v508_v9  ;;  %v510_v16 = vpop.eup %509 }
  0x57   : > { %513 = vrcp.f32 %v223_v10  ;;  %v512_v18 = vpop.eup %511  ;;  %v265_v20 = vmul.f32 %v510_v16, %v263_v15 }
  0x58   : > { %515 = vrcp.f32 %v224_v11  ;;  %v266_v21 = vmul.f32 %v512_v18, %v263_v15 }
  0x64   : > { %v514_v22 = vpop.eup %513 }
  0x65   : > { %v516_v23 = vpop.eup %515  ;;  %229 = vst [vmem:[%s211_s20] sm:$0xff] %v514_v22  ;;  %v243_v24 = vadd.f32 %v514_v22, %v409_v17 }
  0x66   : > { %230 = vst [vmem:[%s211_s20 + $0x8] sm:$0xff] %v516_v23  ;;  %v244_v25 = vadd.f32 %v516_v23, %v240_v19  ;;  %267 = vst [vmem:[%s211_s20] sm:$0xc] %v265_v20 }
  0x67   : > { %v245_v26 = vmul.f32 14.0, %v243_v24  ;;  %268 = vst [vmem:[%s211_s20 + $0x8] sm:$0xc] %v266_v21 }
  0x68   : > { %v246_v27 = vmul.f32 14.0, %v244_v25 }
  0x69   : > { %247 = vst [vmem:[%s211_s20] sm:$0x3] %v245_v26 }
  0x6a   : > { %248 = vst [vmem:[%s211_s20 + $0x8] sm:$0x3] %v246_v27 }
  0x6b   : > { %584 = shalt.err (!%p581_p9)
}
  0x6c   : > { %s585_s6 = scalar_lea.hbm %s286_s29, 256  ;;  %s589_s22 = scalar_lea.hbm %s887_s2, 1024 }
  0x6d   : > { %p586_p6 = scmp.ne.s32.totalorder %s286_s29, %s585_s6  ;;  %p590_p10 = scmp.lt.s32.totalorder %s286_s29, %s887_s2 }
  0x6e   : > { %p591_p0 = scmp.lt.s32.totalorder %s589_s22, %s585_s6 }
  0x6f   : > { %p587_p11 = pnand %p586_p6, %p779_p13 }
  0x70   : > { %p592_p8 = por %p591_p0, %p590_p10 }
  0x71   : > { %p588_p12 = pneg %p587_p11 }
  0x73   : > { %p593_p1 = pnand %p592_p8, %p588_p12 }
  0x75   : > { %596 = shalt.err (!%p593_p1)
}
  0x76   : > { %422 = dma.vmem_to_hbm [thread:$0]  (%p779_p13), %s835_s25, 256, %s286_s29, %s270_s4  }
  0x77 PF: > { %s904_s23 = sld [smem:[#allocation12_spill]]  ;;  %p439_p4 = scmp.ge.s32.totalorder %s671_s16, 2 }
  0x78   : > { %s300_s19 = sand.u32 1, %s643_s9  }
  0x79   : > { %s301_s26 = scalar_lea.sflag [#allocation4], %s300_s19 }
  0x7d   : > { %p905_p3 = scmp.ne.s32.totalorder %s904_s23, 0 }
  0x7f   : > { %p433_p2 = pnand %p439_p4, %p905_p3 }
  0x81   : > { %p434_p5 = pneg %p433_p2 }
  0x83   : > { %638 = dma.done.wait (%p434_p5), %s301_s26, 256  }
  0x84   : > { %640 = vsyncadd (%p434_p5), %s301_s26, 4294967040  ;;  %s19_s16 = sadd.s32 1, %s671_s16   ;;  %s906_s12 = sld [smem:[#allocation11_spill]] }
  0x85   : > { %p16_p7 = scmp.ge.s32.totalorder %s19_s16, 6   ;;  %s907_s14 = sld [smem:[#allocation13_spill]] }
  0x86   : > { %s908_s9 = smov %s647_s10  ;;  %s909_s10 = smov %s651_s11 }
  0x87   : > { %s910_s11 = smov %s796_s28  ;;  %s911_s13 = smov %s667_s15 }
  0x88   : > { %s912_s15 = smov %s918_s30  ;;  %18 = sbr.rel (!%p16_p7) target bundleno = 10 (0xa), region = 78 }
  0x8d   :  { %306 = vsyncpa [#allocation3], 1 }
  0x8e   :  { %308 = vsyncpa [#allocation3 + $0x1], 1 }
  0x8f   :  { %309 = vsyncpa [#allocation6], 1 }
  0x90   :  { %310 = vsyncpa [#allocation4], 1 }
  0x91   :  { %312 = vsyncpa [#allocation4 + $0x1], 1 }

</bundles_post_ra>
